<compile_context>
chip_gen: v5e
topology: v5e:2x2
jax: 0.10.0
libtpu: 0.0.40
codegen_flags: <defaults>
</compile_context>

<pallas_src>
import functools

import jax
import jax.numpy as jnp
from jax import lax
from jax.experimental import pallas as pl
from jax.experimental.pallas import tpu as pltpu


def _round_up(x, m):
    return ((x + m - 1) // m) * m


def sima_kernel(x_ref, w_ref, o_ref, *, n_pad):
    x = x_ref[...]                    # (N_pad, F_pad)
    w = w_ref[...]                    # (F_pad, 2*N_pad)  == [W_i | W_j] (padded)

    # Fused projection: one MXU matmul produces both attention maps.
    # dropout = identity in eval mode.
    a = jnp.maximum(
        jnp.dot(x, w, preferred_element_type=jnp.float32), 0.0)

    # Lane-aligned split (n_pad is a multiple of 128) — in-vreg selection only.
    a_i = a[:, :n_pad]                # relu(X @ W_i)
    a_j = a[:, n_pad:]                # relu(X @ W_j)

    # similarity = A_i @ A_j^T, with the transpose folded into the contraction.
    sim = lax.dot_general(
        a_i, a_j,
        dimension_numbers=(((1,), (1,)), ((), ())),
        preferred_element_type=jnp.float32)

    o_ref[...] = sim.astype(o_ref.dtype)


def sima_forward(node_features, weight_i, weight_j, *, compute_dtype=None):
    n, f = node_features.shape
    assert weight_i.shape == (f, n)
    assert weight_j.shape == (f, n)

    out_dtype = node_features.dtype
    if compute_dtype is None:
        compute_dtype = node_features.dtype

    # Pad all last dims to multiples of 128 (lane-dense loads/stores, unmasked vst).
    n_pad = _round_up(max(n, 1), 128)
    f_pad = _round_up(max(f, 1), 128)

    x_p = jnp.zeros((n_pad, f_pad), compute_dtype)
    x_p = x_p.at[:n, :f].set(node_features.astype(compute_dtype))

    # Packed weight slab: W_i in columns [0, n), W_j in columns [n_pad, n_pad + n).
    w_p = jnp.zeros((f_pad, 2 * n_pad), compute_dtype)
    w_p = w_p.at[:f, :n].set(weight_i.astype(compute_dtype))
    w_p = w_p.at[:f, n_pad:n_pad + n].set(weight_j.astype(compute_dtype))

    itemsize = jnp.dtype(compute_dtype).itemsize
    out_itemsize = jnp.dtype(out_dtype).itemsize
    cost = pl.CostEstimate(
        flops=2 * n_pad * f_pad * (2 * n_pad) + 2 * n_pad * n_pad * n_pad,
        transcendentals=0,
        bytes_accessed=(n_pad * f_pad + f_pad * 2 * n_pad) * itemsize
        + n_pad * n_pad * out_itemsize,
    )

    out_p = pl.pallas_call(
        functools.partial(sima_kernel, n_pad=n_pad),
        out_shape=jax.ShapeDtypeStruct((n_pad, n_pad), out_dtype),
        in_specs=[
            pl.BlockSpec((n_pad, f_pad), lambda: (0, 0),
                         memory_space=pltpu.MemorySpace.VMEM),
            pl.BlockSpec((f_pad, 2 * n_pad), lambda: (0, 0),
                         memory_space=pltpu.MemorySpace.VMEM),
        ],
        out_specs=pl.BlockSpec((n_pad, n_pad), lambda: (0, 0),
                               memory_space=pltpu.MemorySpace.VMEM),
        cost_estimate=cost,
    )(x_p, w_p)

    return out_p[:n, :n].astype(out_dtype)


def sima_reference(x, weight_i, weight_j):
    a_i = jax.nn.relu(x @ weight_i)
    a_j = jax.nn.relu(x @ weight_j)
    return a_i @ a_j.T


if __name__ == "__main__":
    nbr_nodes = 16
    nbr_features = 32

    key = jax.random.PRNGKey(0)
    k_x, k_wi, k_wj = jax.random.split(key, 3)

    # Deterministic synthetic parameters (shapes from SIMA.__init__).
    node_features = jax.random.normal(k_x, (nbr_nodes, nbr_features), jnp.float32)
    weight_i = jax.random.normal(k_wi, (nbr_features, nbr_nodes), jnp.float32)
    weight_j = jax.random.normal(k_wj, (nbr_features, nbr_nodes), jnp.float32)

    ref = sima_reference(node_features, weight_i, weight_j)

    # f32 path: exact (up to f32 rounding) vs. the plain-JAX reference.
    out = jax.block_until_ready(sima_forward(node_features, weight_i, weight_j))
    assert out.shape == (nbr_nodes, nbr_nodes)
    assert jnp.allclose(out, ref, atol=1e-4, rtol=1e-4)

    # bf16-input path (v6e/v7x MXU-native): f32 accumulation, looser tolerance.
    out_bf16 = jax.block_until_ready(
        sima_forward(node_features, weight_i, weight_j,
                     compute_dtype=jnp.bfloat16))
    assert out_bf16.shape == (nbr_nodes, nbr_nodes)
    assert jnp.allclose(out_bf16.astype(jnp.float32), ref, atol=0.5, rtol=5e-2)

    print("KERNEL_OK")
</pallas_src>

<mosaic_0001>
module attributes {stable_mosaic.version = 11 : i64} {
  func.func @sima_kernel(%arg0: memref<128x128xf32, #tpu.memory_space<vmem>>, %arg1: memref<128x256xf32, #tpu.memory_space<vmem>>, %arg2: memref<128x128xf32, #tpu.memory_space<vmem>>) attributes {dimension_semantics = [], scalar_prefetch = 0 : i64, scratch_operands = 0 : i64, tpu.core_type = #tpu.core_type<tc>} {
    %c0 = arith.constant 0 : index
    %c0_0 = arith.constant 0 : index
    %0 = vector.load %arg0[%c0, %c0_0] : memref<128x128xf32, #tpu.memory_space<vmem>>, vector<128x128xf32>
    %c0_1 = arith.constant 0 : index
    %c0_2 = arith.constant 0 : index
    %1 = vector.load %arg1[%c0_1, %c0_2] : memref<128x256xf32, #tpu.memory_space<vmem>>, vector<128x256xf32>
    %cst = arith.constant dense<0.000000e+00> : vector<128x256xf32>
    %2 = tpu.matmul %0, %1, %cst {dimension_numbers = #tpu.dot_dimension_numbers<[1], [0], [0], [1], [0, 0, 1, 1], [], []>} : vector<128x128xf32>, vector<128x256xf32>, vector<128x256xf32> -> vector<128x256xf32>
    %cst_3 = arith.constant 0.000000e+00 : f32
    %3 = vector.broadcast %cst_3 : f32 to vector<128x256xf32>
    %4 = arith.maximumf %2, %3 : vector<128x256xf32>
    %5 = vector.extract_strided_slice %4 {offsets = [0, 0], sizes = [128, 128], strides = [1, 1]} : vector<128x256xf32> to vector<128x128xf32>
    %6 = vector.extract_strided_slice %4 {offsets = [0, 128], sizes = [128, 128], strides = [1, 1]} : vector<128x256xf32> to vector<128x128xf32>
    %cst_4 = arith.constant dense<0.000000e+00> : vector<128x128xf32>
    %7 = tpu.matmul %5, %6, %cst_4 {dimension_numbers = #tpu.dot_dimension_numbers<[1], [1], [0], [0], [0, 0, 1, 0], [], []>} : vector<128x128xf32>, vector<128x128xf32>, vector<128x128xf32> -> vector<128x128xf32>
    %c0_5 = arith.constant 0 : index
    %c0_6 = arith.constant 0 : index
    %8 = vector.load %arg2[%c0_5, %c0_6] : memref<128x128xf32, #tpu.memory_space<vmem>>, vector<128x128xf32>
    tpu.vector_store %arg2[%c0_5, %c0_6], %7 {strides = array<i32>} : memref<128x128xf32, #tpu.memory_space<vmem>>, vector<128x128xf32>,
    return
  }
}

</mosaic_0001>

<bundles_post_ra>
// kernel: tpu_custom_call.1
= control target key start
LH: loop header
LB: loop body
LE: loop exit
PB: predicated region body
PF: predicated region fallthrough
CT: control target
= control target key end

     0   :  { %7 = vsyncpa [#allocation3], 0  ;;  %s526_s0 = inlined_call_operand.hbm [shape: f32[128,128], index: 0, kind: input, shape index: {}]   ;;  %s527_s1 = inlined_call_operand.hbm [shape: f32[128,256], index: 1, kind: input, shape index: {}]   ;;  %s528_s2 = inlined_call_operand.hbm [shape: f32[128,128], index: 2, kind: output, shape index: {}]  }
   0x1   :  { %8 = vsyncpa [#allocation6], 0 }
   0x2   :  { %9 = vsyncpa [#allocation4], 0  ;;  %s14_s11 = sshll.u32 %s526_s0, 4  ;;  %s456_s12 = smov [#allocation2]   ;;  %s15_s11 = int_to_ptr.hbm [resolvable:$true] %s14_s11 }
   0x3   :  { %s16_s13 = sshll.u32 %s456_s12, 4  ;;  %s27_s16 = sshll.u32 %s527_s1, 4  ;;  %s17_s13 = int_to_ptr.vmem [resolvable:$true] %s16_s13  ;;  %s28_s16 = int_to_ptr.hbm [resolvable:$true] %s27_s16 }
   0x4   :  { %s457_s17 = smov 128   ;;  %s458_s18 = smov 8  }
   0x5   :  { %22 = dma.hbm_to_vmem [thread:$0]  %s15_s11, 2048, %s17_s13, [#allocation3], %s457_s17, %s457_s17, %s458_s18  }
   0x6   :  { %s459_s19 = smov [#allocation5]   ;;  %s460_s21 = smov 256  }
   0x7   :  { %s29_s20 = sshll.u32 %s459_s19, 4  ;;  %s461_s0 = smov 16   ;;  %s30_s20 = int_to_ptr.vmem [resolvable:$true] %s29_s20 }
   0x8   :  { %35 = dma.hbm_to_vmem [thread:$0]  %s28_s16, 4096, %s30_s20, [#allocation6], %s460_s21, %s460_s21, %s461_s0  }
   0x9   :  { %450 = dma.done.wait [#allocation3], 2048  }
   0xa   :  { %451 = vsyncadd [#allocation3], 4294965248 }
   0xb   :  { %452 = dma.done.wait [#allocation6], 4096  }
   0xc   :  { %453 = vsyncadd [#allocation6], 4294963200  ;;  %v91_v0 = vld [vmem:[#allocation5 + $0xf8] sm:$0xff]  ;;  %v89_v1 = vld [vmem:[#allocation5 + $0xe8] sm:$0xff]  ;;  %s462_s1 = smov [#allocation7]   ;;  %s341_s25 = sshll.u32 %s528_s2, 4  ;;  %s342_s25 = int_to_ptr.hbm [resolvable:$true] %s341_s25 }
   0xd   :  { %157 = vmatpush.msra.mxu1 %v91_v0  ;;  %v87_v2 = vld [vmem:[#allocation5 + $0xd8] sm:$0xff]  ;;  %v85_v3 = vld [vmem:[#allocation5 + $0xc8] sm:$0xff]  ;;  %v44_v16 = vld [vmem:[#allocation2] sm:$0xff]  ;;  %s339_s22 = sshll.u32 %s462_s1, 4  ;;  %s340_s22 = int_to_ptr.vmem [resolvable:$true] %s339_s22 }
   0xe   :  { %v83_v4 = vld [vmem:[#allocation5 + $0xb8] sm:$0xff]  ;;  %v81_v5 = vld [vmem:[#allocation5 + $0xa8] sm:$0xff]  ;;  %v46_v18 = vld [vmem:[#allocation2 + $0x10] sm:$0xff] }
   0xf   :  { %158 = vmatpush.msra.mxu1 %v89_v1  ;;  %v79_v6 = vld [vmem:[#allocation5 + $0x98] sm:$0xff]  ;;  %v77_v7 = vld [vmem:[#allocation5 + $0x88] sm:$0xff]  ;;  %v48_v20 = vld [vmem:[#allocation2 + $0x20] sm:$0xff] }
  0x10   :  { %v75_v8 = vld [vmem:[#allocation5 + $0x78] sm:$0xff]  ;;  %v73_v9 = vld [vmem:[#allocation5 + $0x68] sm:$0xff]  ;;  %v50_v22 = vld [vmem:[#allocation2 + $0x30] sm:$0xff] }
  0x11   :  { %159 = vmatpush.msra.mxu1 %v87_v2  ;;  %v71_v10 = vld [vmem:[#allocation5 + $0x58] sm:$0xff]  ;;  %v69_v11 = vld [vmem:[#allocation5 + $0x48] sm:$0xff]  ;;  %v52_v24 = vld [vmem:[#allocation2 + $0x40] sm:$0xff] }
  0x12   :  { %v67_v12 = vld [vmem:[#allocation5 + $0x38] sm:$0xff]  ;;  %v65_v13 = vld [vmem:[#allocation5 + $0x28] sm:$0xff]  ;;  %v90_v25 = vld [vmem:[#allocation5 + $0xf0] sm:$0xff] }
  0x13   :  { %160 = vmatpush.msra.mxu1 %v85_v3  ;;  %v63_v14 = vld [vmem:[#allocation5 + $0x18] sm:$0xff]  ;;  %v61_v15 = vld [vmem:[#allocation5 + $0x8] sm:$0xff]  ;;  %92 = vmatpush.msra.mxu0 %v90_v25  ;;  %v88_v27 = vld [vmem:[#allocation5 + $0xe0] sm:$0xff] }
  0x14   :  { %v45_v17 = vld [vmem:[#allocation2 + $0x8] sm:$0xff]  ;;  %v47_v19 = vld [vmem:[#allocation2 + $0x18] sm:$0xff]  ;;  %v86_v28 = vld [vmem:[#allocation5 + $0xd0] sm:$0xff] }
  0x15   :  { %161 = vmatpush.msra.mxu1 %v83_v4  ;;  %v49_v21 = vld [vmem:[#allocation2 + $0x28] sm:$0xff]  ;;  %v51_v23 = vld [vmem:[#allocation2 + $0x38] sm:$0xff]  ;;  %93 = vmatpush.msra.mxu0 %v88_v27  ;;  %v84_v29 = vld [vmem:[#allocation5 + $0xc0] sm:$0xff] }
  0x16   :  { %v53_v26 = vld [vmem:[#allocation2 + $0x48] sm:$0xff]  ;;  %v82_v30 = vld [vmem:[#allocation5 + $0xb0] sm:$0xff]  ;;  %v80_v32 = vld [vmem:[#allocation5 + $0xa0] sm:$0xff] }
  0x17   :  { %162 = vmatpush.msra.mxu1 %v81_v5  ;;  %94 = vmatpush.msra.mxu0 %v86_v28  ;;  %v54_v31 = vld [vmem:[#allocation2 + $0x50] sm:$0xff]  ;;  %v76_v34 = vld [vmem:[#allocation5 + $0x80] sm:$0xff]  ;;  %v55_v36 = vld [vmem:[#allocation2 + $0x58] sm:$0xff] }
  0x18   :  { %v78_v33 = vld [vmem:[#allocation5 + $0x90] sm:$0xff]  ;;  %v72_v37 = vld [vmem:[#allocation5 + $0x60] sm:$0xff]  ;;  %v57_v44 = vld [vmem:[#allocation2 + $0x68] sm:$0xff] }
  0x19   :  { %163 = vmatpush.msra.mxu1 %v79_v6  ;;  %95 = vmatpush.msra.mxu0 %v84_v29  ;;  %v74_v35 = vld [vmem:[#allocation5 + $0x70] sm:$0xff]  ;;  %v56_v39 = vld [vmem:[#allocation2 + $0x60] sm:$0xff]  ;;  %v59_v47 = vld [vmem:[#allocation2 + $0x78] sm:$0xff] }
  0x1a   :  { %v70_v38 = vld [vmem:[#allocation5 + $0x50] sm:$0xff]  ;;  %v68_v40 = vld [vmem:[#allocation5 + $0x40] sm:$0xff] }
  0x1b   :  { %164 = vmatpush.msra.mxu1 %v77_v7  ;;  %96 = vmatpush.msra.mxu0 %v82_v30  ;;  %v66_v41 = vld [vmem:[#allocation5 + $0x30] sm:$0xff]  ;;  %v64_v42 = vld [vmem:[#allocation5 + $0x20] sm:$0xff] }
  0x1c   :  { %v62_v43 = vld [vmem:[#allocation5 + $0x10] sm:$0xff]  ;;  %v60_v45 = vld [vmem:[#allocation5] sm:$0xff] }
  0x1d   :  { %165 = vmatpush.msra.mxu1 %v75_v8  ;;  %97 = vmatpush.msra.mxu0 %v80_v32  ;;  %v58_v46 = vld [vmem:[#allocation2 + $0x70] sm:$0xff] }
  0x1f   :  { %166 = vmatpush.msra.mxu1 %v73_v9  ;;  %98 = vmatpush.msra.mxu0 %v78_v33 }
  0x21   :  { %167 = vmatpush.msra.mxu1 %v71_v10  ;;  %99 = vmatpush.msra.mxu0 %v76_v34 }
  0x23   :  { %168 = vmatpush.msra.mxu1 %v69_v11  ;;  %100 = vmatpush.msra.mxu0 %v74_v35 }
  0x25   :  { %169 = vmatpush.msra.mxu1 %v67_v12  ;;  %101 = vmatpush.msra.mxu0 %v72_v37 }
  0x27   :  { %170 = vmatpush.msra.mxu1 %v65_v13  ;;  %102 = vmatpush.msra.mxu0 %v70_v38 }
  0x29   :  { %171 = vmatpush.msra.mxu1 %v63_v14  ;;  %103 = vmatpush.msra.mxu0 %v68_v40 }
  0x2b   :  { %172 = vmatpush.msra.mxu1 %v61_v15  ;;  %104 = vmatpush.msra.mxu0 %v66_v41 }
  0x2c   :  { %173 = vmatmul.f32.vlgmr.msra.gmra.mxu1 %v44_v16 }
  0x2d   :  { %105 = vmatpush.msra.mxu0 %v64_v42 }
  0x2f   :  { %106 = vmatpush.msra.mxu0 %v62_v43 }
  0x31   :  { %107 = vmatpush.msra.mxu0 %v60_v45 }
  0x32   :  { %108 = vmatmul.f32.vlgmr.msra.gmra.mxu0 %v44_v16 }
  0x34   :  { %176 = vmatmul.f32.gmra.mxu1 %v45_v17 }
  0x3a   :  { %111 = vmatmul.f32.gmra.mxu0 %v45_v17 }
  0x3c   :  { %179 = vmatmul.f32.gmra.mxu1 %v46_v18 }
  0x42   :  { %114 = vmatmul.f32.gmra.mxu0 %v46_v18 }
  0x44   :  { %182 = vmatmul.f32.gmra.mxu1 %v47_v19 }
  0x4a   :  { %117 = vmatmul.f32.gmra.mxu0 %v47_v19 }
  0x4c   :  { %185 = vmatmul.f32.gmra.mxu1 %v48_v20 }
  0x52   :  { %120 = vmatmul.f32.gmra.mxu0 %v48_v20 }
  0x54   :  { %188 = vmatmul.f32.gmra.mxu1 %v49_v21 }
  0x5a   :  { %123 = vmatmul.f32.gmra.mxu0 %v49_v21 }
  0x5c   :  { %191 = vmatmul.f32.gmra.mxu1 %v50_v22 }
  0x62   :  { %126 = vmatmul.f32.gmra.mxu0 %v50_v22 }
  0x64   :  { %194 = vmatmul.f32.gmra.mxu1 %v51_v23 }
  0x6a   :  { %129 = vmatmul.f32.gmra.mxu0 %v51_v23 }
  0x6c   :  { %197 = vmatmul.f32.gmra.mxu1 %v52_v24 }
  0x72   :  { %132 = vmatmul.f32.gmra.mxu0 %v52_v24 }
  0x74   :  { %200 = vmatmul.f32.gmra.mxu1 %v53_v26 }
  0x7a   :  { %135 = vmatmul.f32.gmra.mxu0 %v53_v26 }
  0x7c   :  { %203 = vmatmul.f32.gmra.mxu1 %v54_v31 }
  0x82   :  { %138 = vmatmul.f32.gmra.mxu0 %v54_v31 }
  0x84   :  { %206 = vmatmul.f32.gmra.mxu1 %v55_v36 }
  0x8a   :  { %141 = vmatmul.f32.gmra.mxu0 %v55_v36 }
  0x8c   :  { %209 = vmatmul.f32.gmra.mxu1 %v56_v39 }
  0x92   :  { %144 = vmatmul.f32.gmra.mxu0 %v56_v39 }
  0x94   :  { %212 = vmatmul.f32.gmra.mxu1 %v57_v44 }
  0x9a   :  { %147 = vmatmul.f32.gmra.mxu0 %v57_v44 }
  0x9c   :  { %215 = vmatmul.f32.gmra.mxu1 %v58_v46 }
  0xa2   :  { %150 = vmatmul.f32.gmra.mxu0 %v58_v46 }
  0xa4   :  { %218 = vmatmul.f32.gmra.mxu1 %v59_v47 }
  0xa9   :  { %v487_v48 = vpop.f32.mrf.mxu1 }
  0xaa   :  { %153 = vmatmul.f32.gmra.mxu0 %v59_v47  ;;  %v223_v25 = vmax.f32 %v487_v48, 0.0 }
  0xaf   :  { %v497_v61 = vpop.f32.mrf.mxu0 }
  0xb0   :  { %v222_v27 = vmax.f32 %v497_v61, 0.0 }
  0xb1   :  { %v489_v49 = vpop.f32.mrf.mxu1 }
  0xb2   :  { %v225_v24 = vmax.f32 %v489_v49, 0.0 }
  0xb7   :  { %v499_v63 = vpop.f32.mrf.mxu0 }
  0xb8   :  { %v224_v30 = vmax.f32 %v499_v63, 0.0 }
  0xb9   :  { %v491_v50 = vpop.f32.mrf.mxu1 }
  0xba   :  { %v227_v22 = vmax.f32 %v491_v50, 0.0 }
  0xbf   :  { %v501_v1 = vpop.f32.mrf.mxu0 }
  0xc0   :  { %v226_v33 = vmax.f32 %v501_v1, 0.0 }
  0xc1   :  { %v493_v51 = vpop.f32.mrf.mxu1 }
  0xc2   :  { %v229_v21 = vmax.f32 %v493_v51, 0.0 }
  0xc7   :  { %v503_v5 = vpop.f32.mrf.mxu0 }
  0xc8   :  { %v228_v36 = vmax.f32 %v503_v5, 0.0 }
  0xc9   :  { %v495_v52 = vpop.f32.mrf.mxu1 }
  0xca   :  { %v231_v19 = vmax.f32 %v495_v52, 0.0 }
  0xcf   :  { %v505_v8 = vpop.f32.mrf.mxu0 }
  0xd0   :  { %v230_v39 = vmax.f32 %v505_v8, 0.0 }
  0xd1   :  { %v189_v53 = vpop.f32.mrf.mxu1 }
  0xd2   :  { %v233_v18 = vmax.f32 %v189_v53, 0.0 }
  0xd7   :  { %v507_v11 = vpop.f32.mrf.mxu0 }
  0xd8   :  { %v232_v42 = vmax.f32 %v507_v11, 0.0 }
  0xd9   :  { %v192_v54 = vpop.f32.mrf.mxu1 }
  0xda   :  { %v235_v16 = vmax.f32 %v192_v54, 0.0 }
  0xdf   :  { %v127_v14 = vpop.f32.mrf.mxu0 }
  0xe0   :  { %v234_v44 = vmax.f32 %v127_v14, 0.0 }
  0xe1   :  { %v195_v55 = vpop.f32.mrf.mxu1 }
  0xe2   :  { %v237_v15 = vmax.f32 %v195_v55, 0.0 }
  0xe7   :  { %v130_v17 = vpop.f32.mrf.mxu0 }
  0xe8   :  { %v236_v45 = vmax.f32 %v130_v17, 0.0 }
  0xe9   :  { %v198_v56 = vpop.f32.mrf.mxu1 }
  0xea   :  { %v239_v13 = vmax.f32 %v198_v56, 0.0 }
  0xef   :  { %v133_v20 = vpop.f32.mrf.mxu0 }
  0xf0   :  { %v238_v46 = vmax.f32 %v133_v20, 0.0 }
  0xf1   :  { %v201_v57 = vpop.f32.mrf.mxu1 }
  0xf2   :  { %v241_v12 = vmax.f32 %v201_v57, 0.0 }
  0xf7   :  { %v136_v23 = vpop.f32.mrf.mxu0 }
  0xf8   :  { %v240_v47 = vmax.f32 %v136_v23, 0.0 }
  0xf9   :  { %v204_v58 = vpop.f32.mrf.mxu1 }
  0xfa   :  { %v243_v10 = vmax.f32 %v204_v58, 0.0 }
  0xff   :  { %v139_v26 = vpop.f32.mrf.mxu0 }
 0x100   :  { %v242_v28 = vmax.f32 %v139_v26, 0.0 }
 0x101   :  { %v207_v59 = vpop.f32.mrf.mxu1 }
 0x102   :  { %v245_v9 = vmax.f32 %v207_v59, 0.0 }
 0x107   :  { %v142_v29 = vpop.f32.mrf.mxu0 }
 0x108   :  { %v244_v31 = vmax.f32 %v142_v29, 0.0 }
 0x109   :  { %v210_v60 = vpop.f32.mrf.mxu1 }
 0x10a   :  { %v247_v7 = vmax.f32 %v210_v60, 0.0 }
 0x10f   :  { %v145_v32 = vpop.f32.mrf.mxu0 }
 0x110   :  { %v246_v34 = vmax.f32 %v145_v32, 0.0 }
 0x111   :  { %v213_v62 = vpop.f32.mrf.mxu1 }
 0x112   :  { %v249_v6 = vmax.f32 %v213_v62, 0.0 }
 0x117   :  { %v148_v35 = vpop.f32.mrf.mxu0 }
 0x118   :  { %v248_v37 = vmax.f32 %v148_v35, 0.0 }
 0x119   :  { %v216_v0 = vpop.f32.mrf.mxu1 }
 0x11a   :  { %v251_v4 = vmax.f32 %v216_v0, 0.0 }
 0x11f   :  { %v151_v38 = vpop.f32.mrf.mxu0 }
 0x120   :  { %v250_v40 = vmax.f32 %v151_v38, 0.0 }
 0x121   :  { %v219_v2 = vpop.f32.mrf.mxu1 }
 0x122   :  { %v253_v3 = vmax.f32 %v219_v2, 0.0 }
 0x124   :  { %254 = vmatpush.xpose.msra.mxu2 %v253_v3  ;;  %355 = vmatpush.xpose.msra.mxu3 %v253_v3 }
 0x127   :  { %v154_v41 = vpop.f32.mrf.mxu0 }
 0x128   :  { %255 = vmatpush.xpose.msra.mxu2 %v251_v4  ;;  %356 = vmatpush.xpose.msra.mxu3 %v251_v4  ;;  %v252_v43 = vmax.f32 %v154_v41, 0.0 }
 0x12c   :  { %256 = vmatpush.xpose.msra.mxu2 %v249_v6  ;;  %357 = vmatpush.xpose.msra.mxu3 %v249_v6 }
 0x130   :  { %257 = vmatpush.xpose.msra.mxu2 %v247_v7  ;;  %358 = vmatpush.xpose.msra.mxu3 %v247_v7 }
 0x134   :  { %258 = vmatpush.xpose.msra.mxu2 %v245_v9  ;;  %359 = vmatpush.xpose.msra.mxu3 %v245_v9 }
 0x138   :  { %259 = vmatpush.xpose.msra.mxu2 %v243_v10  ;;  %360 = vmatpush.xpose.msra.mxu3 %v243_v10 }
 0x13c   :  { %260 = vmatpush.xpose.msra.mxu2 %v241_v12  ;;  %361 = vmatpush.xpose.msra.mxu3 %v241_v12 }
 0x140   :  { %261 = vmatpush.xpose.msra.mxu2 %v239_v13  ;;  %362 = vmatpush.xpose.msra.mxu3 %v239_v13 }
 0x144   :  { %262 = vmatpush.xpose.msra.mxu2 %v237_v15  ;;  %363 = vmatpush.xpose.msra.mxu3 %v237_v15 }
 0x148   :  { %263 = vmatpush.xpose.msra.mxu2 %v235_v16  ;;  %364 = vmatpush.xpose.msra.mxu3 %v235_v16 }
 0x14c   :  { %264 = vmatpush.xpose.msra.mxu2 %v233_v18  ;;  %365 = vmatpush.xpose.msra.mxu3 %v233_v18 }
 0x150   :  { %265 = vmatpush.xpose.msra.mxu2 %v231_v19  ;;  %366 = vmatpush.xpose.msra.mxu3 %v231_v19 }
 0x154   :  { %266 = vmatpush.xpose.msra.mxu2 %v229_v21  ;;  %367 = vmatpush.xpose.msra.mxu3 %v229_v21 }
 0x158   :  { %267 = vmatpush.xpose.msra.mxu2 %v227_v22  ;;  %368 = vmatpush.xpose.msra.mxu3 %v227_v22 }
 0x15c   :  { %268 = vmatpush.xpose.msra.mxu2 %v225_v24  ;;  %369 = vmatpush.xpose.msra.mxu3 %v225_v24 }
 0x160   :  { %269 = vmatpush.xpose.msra.mxu2 %v223_v25  ;;  %370 = vmatpush.xpose.msra.mxu3 %v223_v25 }
 0x163   :  { %270 = vmatmul.f32.vlgmr.msra.gmra.mxu2 %v222_v27  ;;  %300 = vmatmul.f32.vlgmr.msra.gmra.mxu3 %v242_v28 }
 0x16b   :  { %273 = vmatmul.f32.gmra.mxu2 %v224_v30  ;;  %303 = vmatmul.f32.gmra.mxu3 %v244_v31 }
 0x173   :  { %276 = vmatmul.f32.gmra.mxu2 %v226_v33  ;;  %306 = vmatmul.f32.gmra.mxu3 %v246_v34 }
 0x17b   :  { %279 = vmatmul.f32.gmra.mxu2 %v228_v36  ;;  %309 = vmatmul.f32.gmra.mxu3 %v248_v37 }
 0x183   :  { %282 = vmatmul.f32.gmra.mxu2 %v230_v39  ;;  %312 = vmatmul.f32.gmra.mxu3 %v250_v40 }
 0x18b   :  { %285 = vmatmul.f32.gmra.mxu2 %v232_v42  ;;  %315 = vmatmul.f32.gmra.mxu3 %v252_v43 }
 0x193   :  { %288 = vmatmul.f32.gmra.mxu2 %v234_v44 }
 0x19b   :  { %291 = vmatmul.f32.gmra.mxu2 %v236_v45 }
 0x1a3   :  { %294 = vmatmul.f32.gmra.mxu2 %v238_v46 }
 0x1ab   :  { %297 = vmatmul.f32.gmra.mxu2 %v240_v47 }
 0x1e6   :  { %v271_v48 = vpop.f32.mrf.mxu2  ;;  %v301_v49 = vpop.f32.mrf.mxu3 }
 0x1e7   :  { %319 = vst [vmem:[#allocation7] sm:$0xff] %v271_v48 }
 0x1e8   :  { %329 = vst [vmem:[#allocation7 + $0x50] sm:$0xff] %v301_v49 }
 0x1ee   :  { %v274_v50 = vpop.f32.mrf.mxu2  ;;  %v304_v51 = vpop.f32.mrf.mxu3 }
 0x1ef   :  { %320 = vst [vmem:[#allocation7 + $0x8] sm:$0xff] %v274_v50 }
 0x1f0   :  { %330 = vst [vmem:[#allocation7 + $0x58] sm:$0xff] %v304_v51 }
 0x1f6   :  { %v277_v52 = vpop.f32.mrf.mxu2  ;;  %v307_v53 = vpop.f32.mrf.mxu3 }
 0x1f7   :  { %321 = vst [vmem:[#allocation7 + $0x10] sm:$0xff] %v277_v52 }
 0x1f8   :  { %331 = vst [vmem:[#allocation7 + $0x60] sm:$0xff] %v307_v53 }
 0x1fe   :  { %v280_v54 = vpop.f32.mrf.mxu2  ;;  %v310_v55 = vpop.f32.mrf.mxu3 }
 0x1ff   :  { %322 = vst [vmem:[#allocation7 + $0x18] sm:$0xff] %v280_v54 }
 0x200   :  { %332 = vst [vmem:[#allocation7 + $0x68] sm:$0xff] %v310_v55 }
 0x206   :  { %v283_v56 = vpop.f32.mrf.mxu2  ;;  %v313_v57 = vpop.f32.mrf.mxu3 }
 0x207   :  { %323 = vst [vmem:[#allocation7 + $0x20] sm:$0xff] %v283_v56 }
 0x208   :  { %333 = vst [vmem:[#allocation7 + $0x70] sm:$0xff] %v313_v57 }
 0x20e   :  { %v286_v58 = vpop.f32.mrf.mxu2  ;;  %v316_v59 = vpop.f32.mrf.mxu3 }
 0x20f   :  { %324 = vst [vmem:[#allocation7 + $0x28] sm:$0xff] %v286_v58 }
 0x210   :  { %334 = vst [vmem:[#allocation7 + $0x78] sm:$0xff] %v316_v59 }
 0x216   :  { %v289_v60 = vpop.f32.mrf.mxu2 }
 0x217   :  { %325 = vst [vmem:[#allocation7 + $0x30] sm:$0xff] %v289_v60 }
 0x21e   :  { %v292_v61 = vpop.f32.mrf.mxu2 }
 0x21f   :  { %326 = vst [vmem:[#allocation7 + $0x38] sm:$0xff] %v292_v61 }
 0x226   :  { %v295_v62 = vpop.f32.mrf.mxu2 }
 0x227   :  { %327 = vst [vmem:[#allocation7 + $0x40] sm:$0xff] %v295_v62 }
 0x22e   :  { %v298_v63 = vpop.f32.mrf.mxu2 }
 0x22f   :  { %328 = vst [vmem:[#allocation7 + $0x48] sm:$0xff] %v298_v63 }
 0x230   :  { %347 = dma.vmem_to_hbm [thread:$0]  %s340_s22, 2048, %s342_s25, [#allocation4], %s457_s17, %s457_s17, %s458_s18  }
 0x231   :  { %454 = dma.done.wait [#allocation4], 2048  }
 0x232   :  { %455 = vsyncadd [#allocation4], 4294965248 }
 0x233   :  { %352 = vsyncpa [#allocation3], 1 }
 0x234   :  { %353 = vsyncpa [#allocation6], 1 }
 0x235   :  { %354 = vsyncpa [#allocation4], 1 }

</bundles_post_ra>
